<compile_context>
chip_gen: v7x
topology: tpu7x:2x2x1
jax: 0.10.0
libtpu: 0.0.40
codegen_flags: <defaults>
</compile_context>

<pallas_src>
import functools

import jax
import jax.numpy as jnp
from jax.experimental import pallas as pl
from jax.experimental.pallas import tpu as pltpu


def _round_up(v, m):
    return ((v + m - 1) // m) * m


def _choose_row_tile(n_rows, block_rows):
    """Pick a 128-aligned row tile and the padded row extent.

    Preference order:
      1. >=2 grid steps when the batch allows it (v7x megacore shards the
         "parallel" row axis across its 2 TensorCores; a 1-step grid can't).
      2. Minimal total work: padded junk rows + per-step overhead
         (~0.35 us/step, modeled as ~64 rows of equivalent work).
      3. Larger tile (better DMA efficiency / fewer steps).
    """
    n128 = _round_up(max(n_rows, 1), 128)
    bm_max = max(min(_round_up(block_rows, 128), n128), 128)
    step_overhead_rows = 64

    def cost(bm):
        n_pad = _round_up(n_rows, bm)
        steps = n_pad // bm
        single_step_penalty = 1 if (steps < 2 and n128 > 128) else 0
        return (single_step_penalty, n_pad + steps * step_overhead_rows, -bm)

    bm = min(range(bm_max, 0, -128), key=cost)
    return bm, _round_up(n_rows, bm)


def mlp_kernel(x_ref, w1_ref, b1_ref, w2_ref, b2_ref, o_ref, *, compute_dtype):
    # fc1: MXU matmul (bf16 operands, f32 accumulation); bias + ReLU on VPU.
    # x arrives in its HBM dtype (f32) and is cast here -- cheaper overall
    # than a separate wrapper-side cast pass over HBM.
    x = x_ref[...].astype(compute_dtype)
    h = jnp.dot(x, w1_ref[...].astype(compute_dtype),
                preferred_element_type=jnp.float32)
    h = jnp.maximum(h + b1_ref[...], 0.0)            # (bm, hid) + (1, hid)
    # fc2: cast activations back to the compute dtype for the MXU, f32 accum.
    o = jnp.dot(h.astype(compute_dtype), w2_ref[...].astype(compute_dtype),
                preferred_element_type=jnp.float32)
    o_ref[...] = (o + b2_ref[...]).astype(o_ref.dtype)   # (bm, out) + (1, out)


@functools.partial(jax.jit, static_argnames=("block_rows", "compute_dtype"))
def mlp_forward(x, w1, b1, w2, b2, *, block_rows=512,
                compute_dtype=jnp.bfloat16):
    N, in_dim = x.shape
    hidden_dim = w1.shape[1]
    out_dim = w2.shape[1]
    out_dtype = x.dtype

    # Only the row axis is tiled / padded.  Feature dims stay at their
    # natural sizes (full-extent blocks), so x and the output carry no lane
    # padding through HBM.  Zero row-padding is semantics-preserving: the
    # extra rows are computed independently and sliced off below.
    bm, n_p = _choose_row_tile(N, block_rows)
    grid = (n_p // bm,)
    x_p = x if n_p == N else jnp.pad(x, ((0, n_p - N), (0, 0)))

    # Biases stay f32 (added to f32 accumulators); 2-D for TPU layout.
    b1_2d = b1.astype(jnp.float32).reshape(1, hidden_dim)
    b2_2d = b2.astype(jnp.float32).reshape(1, out_dim)

    # VMEM budget: double-buffered x/out tiles + resident weights + f32
    # intermediates.  Cap at ~85% of physical per-core VMEM (generation
    # aware: 64 MiB on v7x, 128 MiB on v5e/v6e), floor at 32 MiB so v5e's
    # 16 MiB default scoped limit never binds when bm / dims grow.
    xsz = jnp.dtype(x.dtype).itemsize
    osz = jnp.dtype(out_dtype).itemsize
    w1sz = jnp.dtype(w1.dtype).itemsize
    w2sz = jnp.dtype(w2.dtype).itemsize
    est = (2 * bm * in_dim * xsz                      # x tile (double buffered)
           + 2 * bm * out_dim * osz                   # out tile (double buffered)
           + 2 * in_dim * hidden_dim * w1sz           # W1 (resident, 2 bufs)
           + 2 * hidden_dim * out_dim * w2sz          # W2 (resident, 2 bufs)
           + 2 * (hidden_dim + out_dim) * 4           # biases
           + bm * hidden_dim * 4 + bm * out_dim * 4)  # f32 h / o intermediates
    try:
        vmem_phys = int(pltpu.get_tpu_info().vmem_capacity_bytes)
    except Exception:
        vmem_phys = 64 << 20   # conservative fallback: v7x per-TC VMEM
    vmem_cap = int(vmem_phys * 0.85)
    vmem_limit = int(min(max(2 * est + (4 << 20), 32 << 20), vmem_cap))

    kernel = functools.partial(mlp_kernel, compute_dtype=compute_dtype)

    # NOTE: at production weight sizes, add pipeline_mode=pl.Buffered(1) to
    # the constant-index W1/b1/W2/b2 specs (no pipelining benefit for blocks
    # whose index never changes; halves their resident VMEM on v7x's 64 MiB).
    out_padded = pl.pallas_call(
        kernel,
        out_shape=jax.ShapeDtypeStruct((n_p, out_dim), out_dtype),
        grid_spec=pltpu.PrefetchScalarGridSpec(
            num_scalar_prefetch=0,
            grid=grid,
            in_specs=[
                pl.BlockSpec((bm, in_dim), lambda i: (i, 0)),           # x (streamed)
                pl.BlockSpec((in_dim, hidden_dim), lambda i: (0, 0)),   # W1 (resident)
                pl.BlockSpec((1, hidden_dim), lambda i: (0, 0)),        # b1
                pl.BlockSpec((hidden_dim, out_dim), lambda i: (0, 0)),  # W2 (resident)
                pl.BlockSpec((1, out_dim), lambda i: (0, 0)),           # b2
            ],
            out_specs=pl.BlockSpec((bm, out_dim), lambda i: (i, 0)),
        ),
        compiler_params=pltpu.CompilerParams(
            dimension_semantics=("parallel",),
            vmem_limit_bytes=vmem_limit,
        ),
    )(x_p, w1, b1_2d, w2, b2_2d)

    return out_padded[:N] if n_p != N else out_padded


def xavier_normal(key, in_dim, out_dim, dtype=jnp.float32):
    # Matches torch.nn.init.xavier_normal_: std = sqrt(2 / (fan_in + fan_out))
    std = (2.0 / (in_dim + out_dim)) ** 0.5
    return std * jax.random.normal(key, (in_dim, out_dim), dtype=dtype)


if __name__ == "__main__":
    # Small shapes consistent with the module's forward (x is (N, in_dim)).
    # N is deliberately not tile-aligned (exercises the row-pad path) and big
    # enough that the chosen tile gives a multi-step grid.
    N, in_dim, hidden_dim, out_dim = 300, 32, 64, 16

    key = jax.random.PRNGKey(0)
    k_x, k_w1, k_w2 = jax.random.split(key, 3)

    x = jax.random.normal(k_x, (N, in_dim), dtype=jnp.float32)
    w1 = xavier_normal(k_w1, in_dim, hidden_dim)
    b1 = jnp.zeros((hidden_dim,), dtype=jnp.float32)   # torch.zeros bias init
    w2 = xavier_normal(k_w2, hidden_dim, out_dim)
    b2 = jnp.zeros((out_dim,), dtype=jnp.float32)

    # One-time parameter prep, hoisted out of the per-call path: weights are
    # cast to the bf16 compute dtype exactly once (biases stay f32).
    w1_c = w1.astype(jnp.bfloat16)
    w2_c = w2.astype(jnp.bfloat16)

    out = mlp_forward(x, w1_c, b1, w2_c, b2)
    out = jax.block_until_ready(out)
    assert out.shape == (N, out_dim)

    # Pure-f32 reference (module semantics); loose tolerance for bf16 inputs.
    ref_f32 = jnp.maximum(x @ w1 + b1, 0.0) @ w2 + b2
    assert jnp.allclose(out, ref_f32, atol=5e-2, rtol=5e-2), \
        "mismatch vs f32 reference"

    # Tighter check against a reference mirroring the bf16-in / f32-accum math.
    xh = x.astype(jnp.bfloat16)
    h_ref = jnp.maximum(
        jnp.dot(xh, w1_c, preferred_element_type=jnp.float32) + b1, 0.0)
    ref_mixed = (jnp.dot(h_ref.astype(jnp.bfloat16), w2_c,
                         preferred_element_type=jnp.float32) + b2)
    assert jnp.allclose(out, ref_mixed, atol=2e-3, rtol=2e-3), \
        "mismatch vs mixed-precision reference"

    print("KERNEL_OK")
</pallas_src>

<mosaic_0001>
module attributes {stable_mosaic.version = 11 : i64} {
  func.func @mlp_kernel(%arg0: i32, %arg1: memref<128x32xf32, #tpu.memory_space<vmem>>, %arg2: memref<32x64xbf16, #tpu.memory_space<vmem>>, %arg3: memref<1x64xf32, #tpu.memory_space<vmem>>, %arg4: memref<64x16xbf16, #tpu.memory_space<vmem>>, %arg5: memref<1x16xf32, #tpu.memory_space<vmem>>, %arg6: memref<128x16xf32, #tpu.memory_space<vmem>>) attributes {dimension_semantics = [#tpu.dimension_semantics<parallel>], iteration_bounds = array<i64: 3>, scalar_prefetch = 0 : i64, scratch_operands = 0 : i64, tpu.core_type = #tpu.core_type<tc>, window_params = [{transform_indices = @transform_0, window_bounds = array<i64: 128, 32>}, {pipeline_mode = #tpu.pipeline_mode<synchronous>, transform_indices = @transform_1, window_bounds = array<i64: 32, 64>}, {pipeline_mode = #tpu.pipeline_mode<synchronous>, transform_indices = @transform_2, window_bounds = array<i64: 1, 64>}, {pipeline_mode = #tpu.pipeline_mode<synchronous>, transform_indices = @transform_3, window_bounds = array<i64: 64, 16>}, {pipeline_mode = #tpu.pipeline_mode<synchronous>, transform_indices = @transform_4, window_bounds = array<i64: 1, 16>}, {transform_indices = @transform_5, window_bounds = array<i64: 128, 16>}]} {
    %c0 = arith.constant 0 : index
    %c0_0 = arith.constant 0 : index
    %0 = vector.load %arg1[%c0, %c0_0] : memref<128x32xf32, #tpu.memory_space<vmem>>, vector<128x32xf32>
    %1 = arith.truncf %0 : vector<128x32xf32> to vector<128x32xbf16>
    %c0_1 = arith.constant 0 : index
    %c0_2 = arith.constant 0 : index
    %2 = vector.load %arg2[%c0_1, %c0_2] : memref<32x64xbf16, #tpu.memory_space<vmem>>, vector<32x64xbf16>
    %cst = arith.constant dense<0.000000e+00> : vector<128x64xf32>
    %3 = tpu.matmul %1, %2, %cst {dimension_numbers = #tpu.dot_dimension_numbers<[1], [0], [0], [1], [0, 0, 1, 1], [], []>} : vector<128x32xbf16>, vector<32x64xbf16>, vector<128x64xf32> -> vector<128x64xf32>
    %c0_3 = arith.constant 0 : index
    %c0_4 = arith.constant 0 : index
    %4 = vector.load %arg3[%c0_3, %c0_4] : memref<1x64xf32, #tpu.memory_space<vmem>>, vector<1x64xf32>
    %5 = vector.broadcast %4 : vector<1x64xf32> to vector<128x64xf32>
    %6 = arith.addf %3, %5 : vector<128x64xf32>
    %cst_5 = arith.constant 0.000000e+00 : f32
    %7 = vector.broadcast %cst_5 : f32 to vector<128x64xf32>
    %8 = arith.maximumf %6, %7 : vector<128x64xf32>
    %9 = arith.truncf %8 : vector<128x64xf32> to vector<128x64xbf16>
    %c0_6 = arith.constant 0 : index
    %c0_7 = arith.constant 0 : index
    %10 = vector.load %arg4[%c0_6, %c0_7] : memref<64x16xbf16, #tpu.memory_space<vmem>>, vector<64x16xbf16>
    %cst_8 = arith.constant dense<0.000000e+00> : vector<128x16xf32>
    %11 = tpu.matmul %9, %10, %cst_8 {dimension_numbers = #tpu.dot_dimension_numbers<[1], [0], [0], [1], [0, 0, 1, 1], [], []>} : vector<128x64xbf16>, vector<64x16xbf16>, vector<128x16xf32> -> vector<128x16xf32>
    %c0_9 = arith.constant 0 : index
    %c0_10 = arith.constant 0 : index
    %12 = vector.load %arg5[%c0_9, %c0_10] : memref<1x16xf32, #tpu.memory_space<vmem>>, vector<1x16xf32>
    %13 = vector.broadcast %12 : vector<1x16xf32> to vector<128x16xf32>
    %14 = arith.addf %11, %13 : vector<128x16xf32>
    %c0_11 = arith.constant 0 : index
    %c0_12 = arith.constant 0 : index
    %15 = vector.load %arg6[%c0_11, %c0_12] : memref<128x16xf32, #tpu.memory_space<vmem>>, vector<128x16xf32>
    tpu.vector_store %arg6[%c0_11, %c0_12], %14 {strides = array<i32>} : memref<128x16xf32, #tpu.memory_space<vmem>>, vector<128x16xf32>,
    return
  }
  func.func @transform_0(%arg0: i32) -> (i32, i32) {
    %c0_i32 = arith.constant 0 : i32
    %c0_i32_0 = arith.constant 0 : i32
    return %arg0, %c0_i32 : i32, i32
  }
  func.func @transform_1(%arg0: i32) -> (i32, i32) {
    %c0_i32 = arith.constant 0 : i32
    %c0_i32_0 = arith.constant 0 : i32
    %c0_i32_1 = arith.constant 0 : i32
    return %c0_i32, %c0_i32_0 : i32, i32
  }
  func.func @transform_2(%arg0: i32) -> (i32, i32) {
    %c0_i32 = arith.constant 0 : i32
    %c0_i32_0 = arith.constant 0 : i32
    %c0_i32_1 = arith.constant 0 : i32
    return %c0_i32, %c0_i32_0 : i32, i32
  }
  func.func @transform_3(%arg0: i32) -> (i32, i32) {
    %c0_i32 = arith.constant 0 : i32
    %c0_i32_0 = arith.constant 0 : i32
    %c0_i32_1 = arith.constant 0 : i32
    return %c0_i32, %c0_i32_0 : i32, i32
  }
  func.func @transform_4(%arg0: i32) -> (i32, i32) {
    %c0_i32 = arith.constant 0 : i32
    %c0_i32_0 = arith.constant 0 : i32
    %c0_i32_1 = arith.constant 0 : i32
    return %c0_i32, %c0_i32_0 : i32, i32
  }
  func.func @transform_5(%arg0: i32) -> (i32, i32) {
    %c0_i32 = arith.constant 0 : i32
    %c0_i32_0 = arith.constant 0 : i32
    return %arg0, %c0_i32 : i32, i32
  }
}

</mosaic_0001>

<bundles_post_ra>
// kernel: mlp_forward.1
= control target key start
LH: loop header
LB: loop body
LE: loop exit
PB: predicated region body
PF: predicated region fallthrough
CT: control target
= control target key end

     0   :  { %s809_s18 = smov 0   ;;  %s925_s0 = inlined_call_operand.vmem [shape: f32[384,32], index: 0, kind: input, shape index: {}]   ;;  %s926_s1 = inlined_call_operand.vmem [shape: bf16[32,64], index: 1, kind: input, shape index: {}]   ;;  %s927_s2 = inlined_call_operand.vmem [shape: f32[1,64], index: 2, kind: input, shape index: {}]   ;;  %s928_s3 = inlined_call_operand.vmem [shape: bf16[64,16], index: 3, kind: input, shape index: {}]   ;;  %s929_s4 = inlined_call_operand.vmem [shape: f32[1,16], index: 4, kind: input, shape index: {}]   ;;  %s930_s5 = inlined_call_operand.vmem [shape: f32[384,16], index: 5, kind: output, shape index: {}]  }
   0x1 LB: > { %s656_s19 = sadd.s32 4294967295, %s777_s18   ;;  %p660_p0 = scmp.ge.s32.totalorder %s777_s18, 1  ;;  %s777_s18 = sphi %s809_s18, %s15_s18  }
   0x2   : > { %p188_p1 = scmp.lt.s32.totalorder %s777_s18, 4 }
   0x4   : > { %p189_p2 = pnand %p660_p0, %p188_p1 }
   0x5   : > { %v765_v0 = vld [vmem:[%s926_s1] sm:$0xff] (!%p189_p2)   ;;  %s661_s22 = sshll.u32 (!%p189_p2), %s656_s19, 4  ;;  %v766_v1 = vld [vmem:[%s926_s1 + $0x8] sm:$0xff] (!%p189_p2)   ;;  %vm276_vm0 = vcmask (!%p189_p2), 261120   ;;  %v769_v28 = vld [vmem:[%s928_s3 + $0x10] sm:$0xff] (!%p189_p2)   ;;  %vm461_vm1 = vcmask (!%p189_p2), 523264  }
   0x6   : > { %192 = sbr.rel (%p189_p2) target bundleno = 484 (0x1e4), region = 40  ;;  %p217_p3 = scmp.lt.s32.totalorder (!%p189_p2), %s661_s22, 47  ;;  %713 = vmatprep.subr.bf16.mxu0 (!%p189_p2), %v765_v0  ;;  %v767_v2 = vld [vmem:[%s928_s3] sm:$0xff] (!%p189_p2)   ;;  %v768_v3 = vld [vmem:[%s928_s3 + $0x8] sm:$0xff] (!%p189_p2)   ;;  %v770_v29 = vld [vmem:[%s928_s3 + $0x18] sm:$0xff] (!%p189_p2)   ;;  %vm583_vm2 = vcmask (!%p189_p2), 130048  }
   0x7   : > { %714 = vmatpush3.bf16.msra.mxu0 (!%p189_p2), %v765_v0  ;;  %733 = vmatprep.subr.bf16.mxu1 (!%p189_p2), %v767_v2  ;;  %v665_v30 = vld [vmem:[%s927_s2] ss:$0 sm:$0xff] (!%p189_p2) }
   0x8   : > { %715 = vmatprep.subr.bf16.mxu0 (!%p189_p2), %v766_v1  ;;  %734 = vmatpush3.bf16.msra.mxu1 (!%p189_p2), %v767_v2 }
   0x9   : > { %735 = vmatprep.subr.bf16.mxu1 (!%p189_p2), %v768_v3 }
   0xb   : > { %716 = vmatpush3.bf16.msra.mxu0 (!%p189_p2), %v766_v1 }
   0xc   : > { %736 = vmatpush3.bf16.msra.mxu1 (!%p189_p2), %v768_v3 }
   0xd   : > { %s932_s22 = smov (!%p217_p3, %s661_s22), 47  ;;  %737 = vmatprep.subr.bf16.mxu1 %v769_v28 }
   0xe   : > { %s662_s29 = sshll.u32 %s932_s22, 3 }
   0xf   : > { %s837_s7 = scalar_lea.vmem %s925_s0, %s662_s29  ;;  %s888_s19 = scalar_lea.vmem %s930_s5, %s662_s29 }
  0x10   : > { %v229_v4 = vld [vmem:[%s837_s7] sm:$0xff]  ;;  %v230_v5 = vld [vmem:[%s837_s7 + $0x8] sm:$0xff]  ;;  %v231_v6 = vld [vmem:[%s837_s7 + $0x10] sm:$0xff]  ;;  %738 = vmatpush3.bf16.msra.mxu1 %v769_v28 }
  0x11   : > { %v245_v7 = vpack.c.bf16 %v230_v5, %v229_v4  ;;  %v232_v8 = vld [vmem:[%s837_s7 + $0x18] sm:$0xff]  ;;  %v233_v9 = vld [vmem:[%s837_s7 + $0x20] sm:$0xff]  ;;  %v234_v10 = vld [vmem:[%s837_s7 + $0x28] sm:$0xff]  ;;  %739 = vmatprep.subr.bf16.mxu1 %v770_v29 }
  0x12   : > { %v246_v11 = vpack.c.bf16 %v232_v8, %v231_v6  ;;  %v247_v12 = vpack.c.bf16 %v234_v10, %v233_v9  ;;  %v235_v13 = vld [vmem:[%s837_s7 + $0x30] sm:$0xff]  ;;  %v236_v14 = vld [vmem:[%s837_s7 + $0x38] sm:$0xff]  ;;  %v237_v15 = vld [vmem:[%s837_s7 + $0x40] sm:$0xff] }
  0x13   : > { %717 = vmatprep.mubr.msk.bf16.mxu0 %vm276_vm0, %v245_v7  ;;  %v238_v16 = vld [vmem:[%s837_s7 + $0x48] sm:$0xff]  ;;  %v248_v17 = vpack.c.bf16 %v236_v14, %v235_v13  ;;  %v239_v19 = vld [vmem:[%s837_s7 + $0x50] sm:$0xff]  ;;  %v240_v20 = vld [vmem:[%s837_s7 + $0x58] sm:$0xff] }
  0x14   : > { %718 = vmatmul.mubr.msk.bf16.vlgmr.msra.gmra.mrb[0].mxu0 %vm276_vm0, %v246_v11  ;;  %v249_v18 = vpack.c.bf16 %v238_v16, %v237_v15  ;;  %v241_v21 = vld [vmem:[%s837_s7 + $0x60] sm:$0xff]  ;;  %v242_v22 = vld [vmem:[%s837_s7 + $0x68] sm:$0xff]  ;;  %v250_v23 = vpack.c.bf16 %v240_v20, %v239_v19  ;;  %v243_v25 = vld [vmem:[%s837_s7 + $0x70] sm:$0xff]  ;;  %740 = vmatpush3.bf16.msra.mxu1 %v770_v29 }
  0x15   : > { %721 = vmatprep.mubr.msk.bf16.mxu0 %vm276_vm0, %v247_v12  ;;  %v251_v24 = vpack.c.bf16 %v242_v22, %v241_v21  ;;  %v244_v26 = vld [vmem:[%s837_s7 + $0x78] sm:$0xff] }
  0x16   : > { %v252_v27 = vpack.c.bf16 %v244_v26, %v243_v25 }
  0x1c   : > { %722 = vmatmul.mubr.msk.bf16.gmra.mrb[4].mxu0 %vm276_vm0, %v248_v17 }
  0x1d   : > { %725 = vmatprep.mubr.msk.bf16.mxu0 %vm276_vm0, %v249_v18 }
  0x24   : > { %726 = vmatmul.mubr.msk.bf16.gmra.mrb[8].mxu0 %vm276_vm0, %v250_v23  ;;  %v676_v23 = vld [vmem:[%s929_s4] ss:$0 sm:$0xff] }
  0x25   : > { %729 = vmatprep.mubr.msk.bf16.mxu0 %vm276_vm0, %v251_v24 }
  0x2c   : > { %730 = vmatmul.mubr.msk.bf16.gmra.mrb[12].mxu0 %vm276_vm0, %v252_v27 }
  0xe7   : > { %v719_v31 = vpop.f32.mrb[0].mxu0 }
  0xe8   : > { %v344_v32 = vadd.f32 %v719_v31, %v665_v30  ;;  %v335_v33 = vpop.f32.mrb[1].mxu0 }
  0xe9   : > { %v336_v34 = vadd.f32 %v665_v30, %v335_v33  ;;  %v720_v35 = vpop.f32.mrb[2].mxu0 }
  0xea   : > { %v347_v36 = vadd.f32 %v720_v35, %v665_v30  ;;  %v338_v37 = vpop.f32.mrb[3].mxu0  ;;  %v400_v39 = vmax.f32 %v344_v32, 0.0 }
  0xeb   : > { %v339_v38 = vadd.f32 %v665_v30, %v338_v37  ;;  %v398_v41 = vmax.f32 %v336_v34, 0.0 }
  0xec   : > { %v401_v40 = vmax.f32 %v347_v36, 0.0 }
  0xed   : > { %v399_v42 = vmax.f32 %v339_v38, 0.0 }
  0xee   : > { %v415_v43 = vpack.c.bf16 %v401_v40, %v400_v39 }
  0xef   : > { %v723_v44 = vpop.f32.mrb[4].mxu0  ;;  %v414_v45 = vpack.c.bf16 %v399_v42, %v398_v41 }
  0xf0   : > { %v360_v46 = vadd.f32 %v723_v44, %v665_v30  ;;  %v351_v47 = vpop.f32.mrb[5].mxu0 }
  0xf1   : > { %v352_v48 = vadd.f32 %v665_v30, %v351_v47  ;;  %v724_v49 = vpop.f32.mrb[6].mxu0  ;;  %741 = vmatprep.mubr.msk.bf16.mxu1 %vm461_vm1, %v414_v45 }
  0xf2   : > { %v363_v50 = vadd.f32 %v724_v49, %v665_v30  ;;  %v354_v51 = vpop.f32.mrb[7].mxu0  ;;  %742 = vmatmul.mubr.msk.bf16.vlgmr.msra.gmra.mrb[0].mxu1 %vm461_vm1, %v415_v43  ;;  %v404_v53 = vmax.f32 %v360_v46, 0.0 }
  0xf3   : > { %v355_v52 = vadd.f32 %v665_v30, %v354_v51  ;;  %v402_v55 = vmax.f32 %v352_v48, 0.0 }
  0xf4   : > { %v405_v54 = vmax.f32 %v363_v50, 0.0 }
  0xf5   : > { %v403_v56 = vmax.f32 %v355_v52, 0.0 }
  0xf6   : > { %v417_v57 = vpack.c.bf16 %v405_v54, %v404_v53 }
  0xf7   : > { %v416_v58 = vpack.c.bf16 %v403_v56, %v402_v55  ;;  %v727_v59 = vpop.f32.mrb[8].mxu0 }
  0xf8   : > { %v376_v60 = vadd.f32 %v727_v59, %v665_v30  ;;  %v367_v61 = vpop.f32.mrb[9].mxu0 }
  0xf9   : > { %v368_v62 = vadd.f32 %v665_v30, %v367_v61  ;;  %v728_v63 = vpop.f32.mrb[10].mxu0  ;;  %745 = vmatprep.mubr.msk.bf16.mxu1 %vm461_vm1, %v416_v58 }
  0xfa   : > { %v379_v0 = vadd.f32 %v728_v63, %v665_v30  ;;  %v370_v1 = vpop.f32.mrb[11].mxu0  ;;  %746 = vmatmul.mubr.msk.bf16.gmra.mrb[4].mxu1 %vm461_vm1, %v417_v57  ;;  %v408_v3 = vmax.f32 %v376_v60, 0.0 }
  0xfb   : > { %v371_v2 = vadd.f32 %v665_v30, %v370_v1  ;;  %v406_v5 = vmax.f32 %v368_v62, 0.0 }
  0xfc   : > { %v409_v4 = vmax.f32 %v379_v0, 0.0 }
  0xfd   : > { %v407_v6 = vmax.f32 %v371_v2, 0.0 }
  0xfe   : > { %v419_v7 = vpack.c.bf16 %v409_v4, %v408_v3 }
  0xff   : > { %v418_v8 = vpack.c.bf16 %v407_v6, %v406_v5  ;;  %v731_v9 = vpop.f32.mrb[12].mxu0 }
 0x100   : > { %v392_v10 = vadd.f32 %v731_v9, %v665_v30  ;;  %v383_v11 = vpop.f32.mrb[13].mxu0 }
 0x101   : > { %v384_v12 = vadd.f32 %v665_v30, %v383_v11  ;;  %v732_v13 = vpop.f32.mrb[14].mxu0  ;;  %749 = vmatprep.mubr.msk.bf16.mxu1 %vm461_vm1, %v418_v8 }
 0x102   : > { %v395_v14 = vadd.f32 %v732_v13, %v665_v30  ;;  %v386_v15 = vpop.f32.mrb[15].mxu0  ;;  %750 = vmatmul.mubr.msk.bf16.gmra.mrb[8].mxu1 %vm461_vm1, %v419_v7  ;;  %v412_v17 = vmax.f32 %v392_v10, 0.0 }
 0x103   : > { %v387_v16 = vadd.f32 %v665_v30, %v386_v15  ;;  %v410_v19 = vmax.f32 %v384_v12, 0.0 }
 0x104   : > { %v413_v18 = vmax.f32 %v395_v14, 0.0 }
 0x105   : > { %v411_v20 = vmax.f32 %v387_v16, 0.0 }
 0x106   : > { %v421_v21 = vpack.c.bf16 %v413_v18, %v412_v17 }
 0x107   : > { %v420_v22 = vpack.c.bf16 %v411_v20, %v410_v19 }
 0x109   : > { %753 = vmatprep.mubr.msk.bf16.mxu1 %vm461_vm1, %v420_v22 }
 0x10a   : > { %754 = vmatmul.mubr.msk.bf16.gmra.mrb[12].mxu1 %vm461_vm1, %v421_v21 }
 0x1c5   : > { %v743_v24 = vpop.f32.mrb[0].mxu1 }
 0x1c6   : > { %v529_v25 = vadd.f32 %v743_v24, %v676_v23  ;;  %v520_v26 = vpop.f32.mrb[1].mxu1 }
 0x1c7   : > { %v521_v27 = vadd.f32 %v676_v23, %v520_v26  ;;  %v744_v28 = vpop.f32.mrb[2].mxu1 }
 0x1c8   : > { %586 = vst.msk [vmem:[%s888_s19 + $0x10] sm:$0xff] %vm583_vm2, %v529_v25  ;;  %v532_v29 = vadd.f32 %v744_v28, %v676_v23  ;;  %v523_v30 = vpop.f32.mrb[3].mxu1 }
 0x1c9   : > { %584 = vst.msk [vmem:[%s888_s19] sm:$0xff] %vm583_vm2, %v521_v27  ;;  %v524_v31 = vadd.f32 %v676_v23, %v523_v30 }
 0x1ca   : > { %587 = vst.msk [vmem:[%s888_s19 + $0x18] sm:$0xff] %vm583_vm2, %v532_v29 }
 0x1cb   : > { %585 = vst.msk [vmem:[%s888_s19 + $0x8] sm:$0xff] %vm583_vm2, %v524_v31 }
 0x1cd   : > { %v747_v32 = vpop.f32.mrb[4].mxu1 }
 0x1ce   : > { %v545_v33 = vadd.f32 %v747_v32, %v676_v23  ;;  %v536_v34 = vpop.f32.mrb[5].mxu1 }
 0x1cf   : > { %v537_v35 = vadd.f32 %v676_v23, %v536_v34  ;;  %v748_v36 = vpop.f32.mrb[6].mxu1 }
 0x1d0   : > { %590 = vst.msk [vmem:[%s888_s19 + $0x30] sm:$0xff] %vm583_vm2, %v545_v33  ;;  %v548_v37 = vadd.f32 %v748_v36, %v676_v23  ;;  %v539_v38 = vpop.f32.mrb[7].mxu1 }
 0x1d1   : > { %588 = vst.msk [vmem:[%s888_s19 + $0x20] sm:$0xff] %vm583_vm2, %v537_v35  ;;  %v540_v39 = vadd.f32 %v676_v23, %v539_v38 }
 0x1d2   : > { %591 = vst.msk [vmem:[%s888_s19 + $0x38] sm:$0xff] %vm583_vm2, %v548_v37 }
 0x1d3   : > { %589 = vst.msk [vmem:[%s888_s19 + $0x28] sm:$0xff] %vm583_vm2, %v540_v39 }
 0x1d5   : > { %v751_v40 = vpop.f32.mrb[8].mxu1 }
 0x1d6   : > { %v561_v41 = vadd.f32 %v751_v40, %v676_v23  ;;  %v552_v42 = vpop.f32.mrb[9].mxu1 }
 0x1d7   : > { %v553_v43 = vadd.f32 %v676_v23, %v552_v42  ;;  %v752_v44 = vpop.f32.mrb[10].mxu1 }
 0x1d8   : > { %594 = vst.msk [vmem:[%s888_s19 + $0x50] sm:$0xff] %vm583_vm2, %v561_v41  ;;  %v564_v45 = vadd.f32 %v752_v44, %v676_v23  ;;  %v555_v46 = vpop.f32.mrb[11].mxu1 }
 0x1d9   : > { %592 = vst.msk [vmem:[%s888_s19 + $0x40] sm:$0xff] %vm583_vm2, %v553_v43  ;;  %v556_v47 = vadd.f32 %v676_v23, %v555_v46 }
 0x1da   : > { %595 = vst.msk [vmem:[%s888_s19 + $0x58] sm:$0xff] %vm583_vm2, %v564_v45 }
 0x1db   : > { %593 = vst.msk [vmem:[%s888_s19 + $0x48] sm:$0xff] %vm583_vm2, %v556_v47 }
 0x1dd   : > { %v755_v48 = vpop.f32.mrb[12].mxu1 }
 0x1de   : > { %v577_v49 = vadd.f32 %v755_v48, %v676_v23  ;;  %v568_v50 = vpop.f32.mrb[13].mxu1 }
 0x1df   : > { %v569_v51 = vadd.f32 %v676_v23, %v568_v50  ;;  %v756_v52 = vpop.f32.mrb[14].mxu1 }
 0x1e0   : > { %598 = vst.msk [vmem:[%s888_s19 + $0x70] sm:$0xff] %vm583_vm2, %v577_v49  ;;  %v580_v53 = vadd.f32 %v756_v52, %v676_v23  ;;  %v571_v54 = vpop.f32.mrb[15].mxu1 }
 0x1e1   : > { %596 = vst.msk [vmem:[%s888_s19 + $0x60] sm:$0xff] %vm583_vm2, %v569_v51  ;;  %v572_v55 = vadd.f32 %v676_v23, %v571_v54 }
 0x1e2   : > { %599 = vst.msk [vmem:[%s888_s19 + $0x78] sm:$0xff] %vm583_vm2, %v580_v53 }
 0x1e3   : > { %597 = vst.msk [vmem:[%s888_s19 + $0x68] sm:$0xff] %vm583_vm2, %v572_v55 }
 0x1e4 PF: > { %s15_s18 = sadd.s32 1, %s777_s18  }
 0x1e5   : > { %p12_p4 = scmp.ge.s32.totalorder %s15_s18, 5  }
 0x1e7   :  { %14 = sbr.rel (!%p12_p4) target bundleno = 1 (0x1), region = 70 }

</bundles_post_ra>
